<compile_context>
chip_gen: v7x
topology: tpu7x:2x2x1
jax: 0.10.0
libtpu: 0.0.40
codegen_flags: <defaults>
</compile_context>

<pallas_src>
import functools

import jax
import jax.numpy as jnp
from jax.experimental import pallas as pl
from jax.experimental.pallas import tpu as pltpu


def _round_up(x, m):
    return ((x + m - 1) // m) * m


def _cdiv(a, b):
    return -(-a // b)


def _pick_tiling(batch, tb_cap=2048):
    """Pick (TB, n_tiles): TB a multiple of 128 (lane-dense), TB <= tb_cap,
    and an even number of tiles when >1 so both v7x TensorCores get real work."""
    n_tiles = max(1, _cdiv(batch, tb_cap))
    if n_tiles > 1 and n_tiles % 2 == 1:
        n_tiles += 1
    tb = _round_up(_cdiv(batch, n_tiles), 128)
    return tb, n_tiles


def dqn_kernel(xT_ref, w1t_ref, b1_ref, w2t_ref, b2_ref, oT_ref):
    # Layer 1 on the MXU: (H, K) @ (K, TB) -> (H, TB), f32 accumulation.
    # K=4 is tiny, so this matmul is negligible; bias + ReLU run on the VPU.
    hT = jnp.dot(w1t_ref[...], xT_ref[...], preferred_element_type=jnp.float32)
    hT = jnp.maximum(hT + b1_ref[...], 0.0)          # b1 is (H, 1) -> lane broadcast
    # Layer 2 on the MXU: (Na, H) @ (H, TB) -> (Na, TB).  Na is only 8 sublanes
    # and TB is lane-dense, so the final store is a small, unmasked full-vreg
    # writeback (~16x fewer HBM bytes than a 128-lane-padded output).
    outT = jnp.dot(w2t_ref[...], hT, preferred_element_type=jnp.float32)
    oT_ref[...] = (outT + b2_ref[...]).astype(oT_ref.dtype)


def prepare_dqn_params(w1, b1, w2, b2):
    """One-time param prep (hoisted out of the per-step forward):
    transpose to (in, out)->(out, in)-style kernel layout and pad n_actions
    to 8 sublanes.  Returns (w1t, b1c, w2t, b2c)."""
    k, h = w1.shape
    n_actions = w2.shape[1]
    na = _round_up(max(n_actions, 1), 8)
    w1t = jnp.asarray(w1).T                                   # (H, K)
    b1c = jnp.asarray(b1).reshape(h, 1)                       # (H, 1)
    w2t = jnp.zeros((na, h), w2.dtype).at[:n_actions, :].set(jnp.asarray(w2).T)
    b2c = jnp.zeros((na, 1), b2.dtype).at[:n_actions, 0].set(jnp.asarray(b2))
    return w1t, b1c, w2t, b2c


@functools.partial(jax.jit, static_argnames=("n_actions",))
def dqn_forward(x, w1t, b1c, w2t, b2c, *, n_actions):
    """x: (B, input_size); returns (B, n_actions) Q-values."""
    B, K = x.shape
    H = w1t.shape[0]
    Na = w2t.shape[0]

    TB, n_tiles = _pick_tiling(B)
    Bp = TB * n_tiles

    # Batch on the lane axis: x^T is (K, Bp), lane-dense & contiguous per tile.
    xT = x.T
    if Bp != B:
        xT = jnp.pad(xT, ((0, 0), (0, Bp - B)))

    outT = pl.pallas_call(
        dqn_kernel,
        out_shape=jax.ShapeDtypeStruct((Na, Bp), x.dtype),
        grid=(n_tiles,),
        in_specs=[
            pl.BlockSpec((K, TB), lambda i: (0, i)),   # x^T: tiled along batch lanes
            pl.BlockSpec((H, K), lambda i: (0, 0)),    # W1^T: VMEM-resident
            pl.BlockSpec((H, 1), lambda i: (0, 0)),    # b1:   VMEM-resident
            pl.BlockSpec((Na, H), lambda i: (0, 0)),   # W2^T (8-sublane padded): resident
            pl.BlockSpec((Na, 1), lambda i: (0, 0)),   # b2   (8-sublane padded): resident
        ],
        out_specs=pl.BlockSpec((Na, TB), lambda i: (0, i)),
        compiler_params=pltpu.CompilerParams(
            dimension_semantics=("parallel",),         # megacore shard on v7x
        ),
    )(xT, w1t, b1c, w2t, b2c)

    # Only Na * Bp floats (8 sublanes) ever hit HBM; slice back to logical shape.
    return outT[:n_actions, :B].T


def init_dqn_params(key, input_size, n_actions, hidden=128, dtype=jnp.float32):
    """Deterministic init mimicking PyTorch nn.Linear default (U(-1/sqrt(fan_in), +))."""
    k1, k2, k3, k4 = jax.random.split(key, 4)
    lim1 = 1.0 / jnp.sqrt(jnp.asarray(input_size, dtype))
    lim2 = 1.0 / jnp.sqrt(jnp.asarray(hidden, dtype))
    w1 = jax.random.uniform(k1, (input_size, hidden), dtype, -lim1, lim1)
    b1 = jax.random.uniform(k2, (hidden,), dtype, -lim1, lim1)
    w2 = jax.random.uniform(k3, (hidden, n_actions), dtype, -lim2, lim2)
    b2 = jax.random.uniform(k4, (n_actions,), dtype, -lim2, lim2)
    return w1, b1, w2, b2


def _ref_forward(x, w1, b1, w2, b2):
    return jnp.maximum(x @ w1 + b1, 0.0) @ w2 + b2


if __name__ == "__main__":
    # CartPole-like sizes: observation dim 4, 2 actions.
    input_size, n_actions = 4, 2

    key = jax.random.PRNGKey(0)
    kx_small, kp, kx_big = jax.random.split(key, 3)

    w1, b1, w2, b2 = init_dqn_params(kp, input_size, n_actions)
    params = prepare_dqn_params(w1, b1, w2, b2)        # one-time padding/transpose

    # Action-selection-sized batch (B=2): pads to a single 128-lane tile.
    x_small = jax.random.normal(kx_small, (2, input_size), jnp.float32)
    out_small = jax.block_until_ready(
        dqn_forward(x_small, *params, n_actions=n_actions))
    ref_small = _ref_forward(x_small, w1, b1, w2, b2)
    assert out_small.shape == (2, n_actions)
    assert jnp.allclose(out_small, ref_small, atol=1e-5, rtol=1e-5)

    # Training-minibatch-sized batch: exercises the multi-tile (even-split,
    # megacore-parallel) grid path: 2304 -> 2 tiles of TB=1152.
    x_big = jax.random.normal(kx_big, (2304, input_size), jnp.float32)
    out_big = jax.block_until_ready(
        dqn_forward(x_big, *params, n_actions=n_actions))
    ref_big = _ref_forward(x_big, w1, b1, w2, b2)
    assert out_big.shape == (2304, n_actions)
    assert jnp.allclose(out_big, ref_big, atol=1e-5, rtol=1e-5)

    print("KERNEL_OK")
</pallas_src>

<mosaic_0001>
module attributes {stable_mosaic.version = 11 : i64} {
  func.func @dqn_kernel(%arg0: i32, %arg1: memref<4x128xf32, #tpu.memory_space<vmem>>, %arg2: memref<128x4xf32, #tpu.memory_space<vmem>>, %arg3: memref<128x1xf32, #tpu.memory_space<vmem>>, %arg4: memref<8x128xf32, #tpu.memory_space<vmem>>, %arg5: memref<8x1xf32, #tpu.memory_space<vmem>>, %arg6: memref<8x128xf32, #tpu.memory_space<vmem>>) attributes {dimension_semantics = [#tpu.dimension_semantics<parallel>], iteration_bounds = array<i64: 1>, scalar_prefetch = 0 : i64, scratch_operands = 0 : i64, tpu.core_type = #tpu.core_type<tc>, window_params = [{transform_indices = @transform_0, window_bounds = array<i64: 4, 128>}, {pipeline_mode = #tpu.pipeline_mode<synchronous>, transform_indices = @transform_1, window_bounds = array<i64: 128, 4>}, {pipeline_mode = #tpu.pipeline_mode<synchronous>, transform_indices = @transform_2, window_bounds = array<i64: 128, 1>}, {pipeline_mode = #tpu.pipeline_mode<synchronous>, transform_indices = @transform_3, window_bounds = array<i64: 8, 128>}, {pipeline_mode = #tpu.pipeline_mode<synchronous>, transform_indices = @transform_4, window_bounds = array<i64: 8, 1>}, {transform_indices = @transform_5, window_bounds = array<i64: 8, 128>}]} {
    %c0 = arith.constant 0 : index
    %c0_0 = arith.constant 0 : index
    %0 = vector.load %arg2[%c0, %c0_0] : memref<128x4xf32, #tpu.memory_space<vmem>>, vector<128x4xf32>
    %c0_1 = arith.constant 0 : index
    %c0_2 = arith.constant 0 : index
    %1 = vector.load %arg1[%c0_1, %c0_2] : memref<4x128xf32, #tpu.memory_space<vmem>>, vector<4x128xf32>
    %cst = arith.constant dense<0.000000e+00> : vector<128x128xf32>
    %2 = tpu.matmul %0, %1, %cst {dimension_numbers = #tpu.dot_dimension_numbers<[1], [0], [0], [1], [0, 0, 1, 1], [], []>} : vector<128x4xf32>, vector<4x128xf32>, vector<128x128xf32> -> vector<128x128xf32>
    %c0_3 = arith.constant 0 : index
    %c0_4 = arith.constant 0 : index
    %3 = vector.load %arg3[%c0_3, %c0_4] : memref<128x1xf32, #tpu.memory_space<vmem>>, vector<128x1xf32>
    %4 = vector.broadcast %3 : vector<128x1xf32> to vector<128x128xf32>
    %5 = arith.addf %2, %4 : vector<128x128xf32>
    %cst_5 = arith.constant 0.000000e+00 : f32
    %6 = vector.broadcast %cst_5 : f32 to vector<128x128xf32>
    %7 = arith.maximumf %5, %6 : vector<128x128xf32>
    %c0_6 = arith.constant 0 : index
    %c0_7 = arith.constant 0 : index
    %8 = vector.load %arg4[%c0_6, %c0_7] : memref<8x128xf32, #tpu.memory_space<vmem>>, vector<8x128xf32>
    %cst_8 = arith.constant dense<0.000000e+00> : vector<8x128xf32>
    %9 = tpu.matmul %8, %7, %cst_8 {dimension_numbers = #tpu.dot_dimension_numbers<[1], [0], [0], [1], [0, 0, 1, 1], [], []>} : vector<8x128xf32>, vector<128x128xf32>, vector<8x128xf32> -> vector<8x128xf32>
    %c0_9 = arith.constant 0 : index
    %c0_10 = arith.constant 0 : index
    %10 = vector.load %arg5[%c0_9, %c0_10] : memref<8x1xf32, #tpu.memory_space<vmem>>, vector<8x1xf32>
    %11 = vector.broadcast %10 : vector<8x1xf32> to vector<8x128xf32>
    %12 = arith.addf %9, %11 : vector<8x128xf32>
    %c0_11 = arith.constant 0 : index
    %c0_12 = arith.constant 0 : index
    %13 = vector.load %arg6[%c0_11, %c0_12] : memref<8x128xf32, #tpu.memory_space<vmem>>, vector<8x128xf32>
    tpu.vector_store %arg6[%c0_11, %c0_12], %12 {strides = array<i32>} : memref<8x128xf32, #tpu.memory_space<vmem>>, vector<8x128xf32>,
    return
  }
  func.func @transform_0(%arg0: i32) -> (i32, i32) {
    %c0_i32 = arith.constant 0 : i32
    %c0_i32_0 = arith.constant 0 : i32
    return %c0_i32, %arg0 : i32, i32
  }
  func.func @transform_1(%arg0: i32) -> (i32, i32) {
    %c0_i32 = arith.constant 0 : i32
    %c0_i32_0 = arith.constant 0 : i32
    %c0_i32_1 = arith.constant 0 : i32
    return %c0_i32, %c0_i32_0 : i32, i32
  }
  func.func @transform_2(%arg0: i32) -> (i32, i32) {
    %c0_i32 = arith.constant 0 : i32
    %c0_i32_0 = arith.constant 0 : i32
    %c0_i32_1 = arith.constant 0 : i32
    return %c0_i32, %c0_i32_0 : i32, i32
  }
  func.func @transform_3(%arg0: i32) -> (i32, i32) {
    %c0_i32 = arith.constant 0 : i32
    %c0_i32_0 = arith.constant 0 : i32
    %c0_i32_1 = arith.constant 0 : i32
    return %c0_i32, %c0_i32_0 : i32, i32
  }
  func.func @transform_4(%arg0: i32) -> (i32, i32) {
    %c0_i32 = arith.constant 0 : i32
    %c0_i32_0 = arith.constant 0 : i32
    %c0_i32_1 = arith.constant 0 : i32
    return %c0_i32, %c0_i32_0 : i32, i32
  }
  func.func @transform_5(%arg0: i32) -> (i32, i32) {
    %c0_i32 = arith.constant 0 : i32
    %c0_i32_0 = arith.constant 0 : i32
    return %c0_i32, %arg0 : i32, i32
  }
}

</mosaic_0001>

<bundles_post_ra>
// kernel: dqn_forward.1
= control target key start
LH: loop header
LB: loop body
LE: loop exit
PB: predicated region body
PF: predicated region fallthrough
CT: control target
= control target key end

     0   :  { %vm182_vm0 = vcmask 1043456   ;;  %vm133_vm1 = vcmask 31744   ;;  %v571_v3 = vmov 0   ;;  %v572_v35 = vmov 0.0|0.0   ;;  %s737_s0 = inlined_call_operand.vmem [shape: f32[4,128], index: 0, kind: input, shape index: {}]   ;;  %s738_s1 = inlined_call_operand.vmem [shape: f32[128,4], index: 1, kind: input, shape index: {}]   ;;  %s739_s2 = inlined_call_operand.vmem [shape: f32[128,1], index: 2, kind: input, shape index: {}]   ;;  %s740_s4 = inlined_call_operand.vmem [shape: f32[8,1], index: 4, kind: input, shape index: {}]   ;;  %s741_s3 = inlined_call_operand.vmem [shape: f32[8,128], index: 3, kind: input, shape index: {}]   ;;  %s742_s5 = inlined_call_operand.vmem [shape: f32[8,128], index: 5, kind: output, shape index: {}]  }
   0x1   :  { %v36_v0 = vld [vmem:[%s737_s0] sm:$0xf]  ;;  %v21_v2 = vld [vmem:[%s738_s1 + $0x8] sm:$0xff]  ;;  %569 = vset.pattern.permute.xlu0 %v571_v3  ;;  %570 = vset.pattern.permute.xlu1 %v571_v3  ;;  %v22_v4 = vld [vmem:[%s738_s1 + $0x10] sm:$0xff]  ;;  %vm573_vm2 = vmmov 0   ;;  %v574_v36 = vmov 0.0  }
   0x2   :  { %v20_v1 = vld [vmem:[%s738_s1] sm:$0xff]  ;;  %480 = vmatprep.subr.msk.mxu0 %vm182_vm0, %v36_v0  ;;  %v23_v5 = vld [vmem:[%s738_s1 + $0x18] sm:$0xff]  ;;  %v39_v8 = vld [vmem:[%s739_s2 + $0x10] sm:$0xff]  ;;  %541 = vmatprep.subr.bf16.mxu1 %v572_v35 }
   0x3   :  { %482 = vmatprep.mubr.msk.f32.mxu0 %vm133_vm1, %v20_v1  ;;  %481 = vmatpush3.msk.msra.mxu0 %vm182_vm0, %v36_v0  ;;  %v24_v6 = vld [vmem:[%s738_s1 + $0x20] sm:$0xff]  ;;  %v38_v9 = vld [vmem:[%s739_s2 + $0x8] sm:$0xff]  ;;  %v40_v11 = vld [vmem:[%s739_s2 + $0x18] sm:$0xff] }
   0x4   :  { %483 = vmatmul.mubr.msk.f32.vlgmr.msra.gmra.mrb[0].mxu0 %vm133_vm1, %v21_v2  ;;  %v37_v7 = vld [vmem:[%s739_s2] sm:$0xff]  ;;  %65 = vperm.xlu1 %570, %v39_v8   ;;  %v25_v10 = vld [vmem:[%s738_s1 + $0x28] sm:$0xff]  ;;  %v26_v12 = vld [vmem:[%s738_s1 + $0x30] sm:$0xff] }
   0x5   :  { %485 = vmatprep.mubr.msk.f32.mxu0 %vm133_vm1, %v22_v4  ;;  %55 = vperm.xlu0 %569, %v37_v7   ;;  %v41_v13 = vld [vmem:[%s739_s2 + $0x20] sm:$0xff]  ;;  %v27_v14 = vld [vmem:[%s738_s1 + $0x38] sm:$0xff]  ;;  %v42_v15 = vld [vmem:[%s739_s2 + $0x28] sm:$0xff] }
   0x6   :  { %v28_v16 = vld [vmem:[%s738_s1 + $0x40] sm:$0xff]  ;;  %v43_v17 = vld [vmem:[%s739_s2 + $0x30] sm:$0xff]  ;;  %v29_v18 = vld [vmem:[%s738_s1 + $0x48] sm:$0xff]  ;;  %538 = vmatprep.mubr.msk.f32.mxu1 %vm573_vm2, %v574_v36 }
   0x7   :  { %v44_v19 = vld [vmem:[%s739_s2 + $0x38] sm:$0xff]  ;;  %v30_v20 = vld [vmem:[%s738_s1 + $0x50] sm:$0xff]  ;;  %v45_v21 = vld [vmem:[%s739_s2 + $0x40] sm:$0xff] }
   0x8   :  { %486 = vmatmul.mubr.msk.f32.gmra.mrb[2].mxu0 %vm133_vm1, %v23_v5  ;;  %70 = vperm.xlu1 %570, %v40_v11   ;;  %v31_v22 = vld [vmem:[%s738_s1 + $0x58] sm:$0xff]  ;;  %v46_v23 = vld [vmem:[%s739_s2 + $0x48] sm:$0xff]  ;;  %v32_v24 = vld [vmem:[%s738_s1 + $0x60] sm:$0xff] }
   0x9   :  { %488 = vmatprep.mubr.msk.f32.mxu0 %vm133_vm1, %v24_v6  ;;  %60 = vperm.xlu0 %569, %v38_v9   ;;  %v47_v25 = vld [vmem:[%s739_s2 + $0x50] sm:$0xff]  ;;  %v33_v26 = vld [vmem:[%s738_s1 + $0x68] sm:$0xff]  ;;  %v48_v27 = vld [vmem:[%s739_s2 + $0x58] sm:$0xff] }
   0xa   :  { %v34_v28 = vld [vmem:[%s738_s1 + $0x70] sm:$0xff]  ;;  %v49_v29 = vld [vmem:[%s739_s2 + $0x60] sm:$0xff]  ;;  %v35_v30 = vld [vmem:[%s738_s1 + $0x78] sm:$0xff] }
   0xb   :  { %v50_v31 = vld [vmem:[%s739_s2 + $0x68] sm:$0xff]  ;;  %v51_v32 = vld [vmem:[%s739_s2 + $0x70] sm:$0xff]  ;;  %v52_v33 = vld [vmem:[%s739_s2 + $0x78] sm:$0xff] }
   0xc   :  { %489 = vmatmul.mubr.msk.f32.gmra.mrb[4].mxu0 %vm133_vm1, %v25_v10  ;;  %80 = vperm.xlu1 %570, %v42_v15   ;;  %v348_v34 = vld [vmem:[%s740_s4] sm:$0xff] }
   0xd   :  { %491 = vmatprep.mubr.msk.f32.mxu0 %vm133_vm1, %v26_v12  ;;  %75 = vperm.xlu0 %569, %v41_v13  }
  0x10   :  { %492 = vmatmul.mubr.msk.f32.gmra.mrb[6].mxu0 %vm133_vm1, %v27_v14  ;;  %90 = vperm.xlu1 %570, %v44_v19  }
  0x11   :  { %494 = vmatprep.mubr.msk.f32.mxu0 %vm133_vm1, %v28_v16  ;;  %85 = vperm.xlu0 %569, %v43_v17  }
  0x14   :  { %495 = vmatmul.mubr.msk.f32.gmra.mrb[8].mxu0 %vm133_vm1, %v29_v18  ;;  %100 = vperm.xlu1 %570, %v46_v23  }
  0x15   :  { %497 = vmatprep.mubr.msk.f32.mxu0 %vm133_vm1, %v30_v20  ;;  %95 = vperm.xlu0 %569, %v45_v21  }
  0x18   :  { %498 = vmatmul.mubr.msk.f32.gmra.mrb[10].mxu0 %vm133_vm1, %v31_v22  ;;  %110 = vperm.xlu1 %570, %v48_v27  }
  0x19   :  { %500 = vmatprep.mubr.msk.f32.mxu0 %vm133_vm1, %v32_v24  ;;  %105 = vperm.xlu0 %569, %v47_v25  }
  0x1c   :  { %501 = vmatmul.mubr.msk.f32.gmra.mrb[12].mxu0 %vm133_vm1, %v33_v26  ;;  %120 = vperm.xlu1 %570, %v50_v31  }
  0x1d   :  { %503 = vmatprep.mubr.msk.f32.mxu0 %vm133_vm1, %v34_v28  ;;  %115 = vperm.xlu0 %569, %v49_v29  }
  0x20   :  { %504 = vmatmul.mubr.msk.f32.gmra.mrb[14].mxu0 %vm133_vm1, %v35_v30  ;;  %130 = vperm.xlu1 %570, %v52_v33  }
  0x21   :  { %125 = vperm.xlu0 %569, %v51_v32  }
  0x25   :  { %351 = vperm.xlu0 %569, %v348_v34  }
  0x83   :  { %v66_v37 = vpop.permute.xlu1 %65 }
  0x84   :  { %v56_v38 = vpop.permute.xlu0 %55 }
  0x87   :  { %v71_v39 = vpop.permute.xlu1 %70 }
  0x88   :  { %v61_v40 = vpop.permute.xlu0 %60 }
  0x8b   :  { %v81_v41 = vpop.permute.xlu1 %80 }
  0x8c   :  { %v76_v42 = vpop.permute.xlu0 %75 }
  0x8f   :  { %v91_v48 = vpop.permute.xlu1 %90 }
  0x90   :  { %v86_v51 = vpop.permute.xlu0 %85 }
  0x93   :  { %v101_v61 = vpop.permute.xlu1 %100 }
  0x94   :  { %v96_v0 = vpop.permute.xlu0 %95 }
  0x97   :  { %v111_v9 = vpop.permute.xlu1 %110 }
  0x98   :  { %v106_v12 = vpop.permute.xlu0 %105 }
  0x9b   :  { %v121_v22 = vpop.permute.xlu1 %120 }
  0x9c   :  { %v116_v25 = vpop.permute.xlu0 %115 }
  0x9f   :  { %v131_v34 = vpop.permute.xlu1 %130 }
  0xd7   :  { %v484_v43 = vpop.f32.mrb[0].mxu0 }
  0xd8   :  { %v258_v44 = vadd.f32 %v484_v43, %v61_v40  ;;  %v252_v45 = vpop.f32.mrb[1].mxu0 }
  0xd9   :  { %v253_v46 = vadd.f32 %v252_v45, %v56_v38  ;;  %v126_v38 = vpop.permute.xlu0 %125 }
  0xda   :  { %v332_v47 = vmax.f32 %v258_v44, 0.0 }
  0xdb   :  { %v331_v49 = vmax.f32 %v253_v46, 0.0  ;;  %v487_v50 = vpop.f32.mrb[2].mxu0  ;;  %v347_v46 = vld [vmem:[%s741_s3] sm:$0xff] }
  0xdc   :  { %v268_v52 = vadd.f32 %v487_v50, %v71_v39  ;;  %v262_v53 = vpop.f32.mrb[3].mxu0 }
  0xdd   :  { %v263_v54 = vadd.f32 %v262_v53, %v66_v37  ;;  %v542_v55 = vpack.c.bf16 %v332_v47, %v331_v49  ;;  %v352_v47 = vpop.permute.xlu0 %351 }
  0xde   :  { %v334_v56 = vmax.f32 %v268_v52, 0.0 }
  0xdf   :  { %v333_v57 = vmax.f32 %v263_v54, 0.0  ;;  %v490_v58 = vpop.f32.mrb[4].mxu0  ;;  %543 = vmatpush3.bf16.msra.mxu1 %v542_v55 }
  0xe0   :  { %v278_v59 = vadd.f32 %v490_v58, %v81_v41  ;;  %v272_v60 = vpop.f32.mrb[5].mxu0  ;;  %544 = vmatprep.subr.bf16.mxu1 %v572_v35 }
  0xe1   :  { %v545_v62 = vpack.c.bf16 %v334_v56, %v333_v57  ;;  %v273_v63 = vadd.f32 %v272_v60, %v76_v42 }
  0xe2   :  { %v336_v1 = vmax.f32 %v278_v59, 0.0 }
  0xe3   :  { %v335_v2 = vmax.f32 %v273_v63, 0.0  ;;  %v493_v3 = vpop.f32.mrb[6].mxu0  ;;  %546 = vmatpush3.bf16.msra.mxu1 %v545_v62 }
  0xe4   :  { %v288_v4 = vadd.f32 %v493_v3, %v91_v48  ;;  %v282_v5 = vpop.f32.mrb[7].mxu0  ;;  %547 = vmatprep.subr.bf16.mxu1 %v572_v35 }
  0xe5   :  { %v548_v6 = vpack.c.bf16 %v336_v1, %v335_v2  ;;  %v283_v7 = vadd.f32 %v282_v5, %v86_v51 }
  0xe6   :  { %v338_v8 = vmax.f32 %v288_v4, 0.0 }
  0xe7   :  { %v337_v10 = vmax.f32 %v283_v7, 0.0  ;;  %v496_v11 = vpop.f32.mrb[8].mxu0  ;;  %549 = vmatpush3.bf16.msra.mxu1 %v548_v6 }
  0xe8   :  { %v298_v13 = vadd.f32 %v496_v11, %v101_v61  ;;  %v292_v14 = vpop.f32.mrb[9].mxu0  ;;  %550 = vmatprep.subr.bf16.mxu1 %v572_v35 }
  0xe9   :  { %v551_v15 = vpack.c.bf16 %v338_v8, %v337_v10  ;;  %v293_v16 = vadd.f32 %v292_v14, %v96_v0 }
  0xea   :  { %v340_v17 = vmax.f32 %v298_v13, 0.0 }
  0xeb   :  { %v339_v18 = vmax.f32 %v293_v16, 0.0  ;;  %v499_v19 = vpop.f32.mrb[10].mxu0  ;;  %552 = vmatpush3.bf16.msra.mxu1 %v551_v15 }
  0xec   :  { %v308_v20 = vadd.f32 %v499_v19, %v111_v9  ;;  %v302_v21 = vpop.f32.mrb[11].mxu0  ;;  %553 = vmatprep.subr.bf16.mxu1 %v572_v35 }
  0xed   :  { %v554_v23 = vpack.c.bf16 %v340_v17, %v339_v18  ;;  %v303_v24 = vadd.f32 %v302_v21, %v106_v12 }
  0xee   :  { %v342_v26 = vmax.f32 %v308_v20, 0.0 }
  0xef   :  { %v341_v27 = vmax.f32 %v303_v24, 0.0  ;;  %v502_v28 = vpop.f32.mrb[12].mxu0  ;;  %555 = vmatpush3.bf16.msra.mxu1 %v554_v23 }
  0xf0   :  { %v318_v29 = vadd.f32 %v502_v28, %v121_v22  ;;  %v312_v30 = vpop.f32.mrb[13].mxu0  ;;  %556 = vmatprep.subr.bf16.mxu1 %v572_v35 }
  0xf1   :  { %v557_v31 = vpack.c.bf16 %v342_v26, %v341_v27  ;;  %v313_v32 = vadd.f32 %v312_v30, %v116_v25 }
  0xf2   :  { %v344_v33 = vmax.f32 %v318_v29, 0.0 }
  0xf3   :  { %v343_v36 = vmax.f32 %v313_v32, 0.0  ;;  %v505_v37 = vpop.f32.mrb[14].mxu0  ;;  %558 = vmatpush3.bf16.msra.mxu1 %v557_v31 }
  0xf4   :  { %v328_v39 = vadd.f32 %v505_v37, %v131_v34  ;;  %v322_v40 = vpop.f32.mrb[15].mxu0  ;;  %559 = vmatprep.subr.bf16.mxu1 %v572_v35 }
  0xf5   :  { %v560_v41 = vpack.c.bf16 %v344_v33, %v343_v36  ;;  %v323_v42 = vadd.f32 %v322_v40, %v126_v38 }
  0xf6   :  { %v346_v43 = vmax.f32 %v328_v39, 0.0 }
  0xf7   :  { %v345_v44 = vmax.f32 %v323_v42, 0.0  ;;  %561 = vmatpush3.bf16.msra.mxu1 %v560_v41 }
  0xf8   :  { %562 = vmatprep.subr.bf16.mxu1 %v572_v35 }
  0xf9   :  { %v563_v45 = vpack.c.bf16 %v346_v43, %v345_v44 }
  0xfb   :  { %564 = vmatpush3.bf16.msra.mxu1 %v563_v45 }
  0xfe   :  { %539 = vmatmul.mubr.f32.vlgmr.msra.gmra.mrb[0].mxu1 %v347_v46 }
 0x1d1   :  { %v420_v48 = vpop.f32.mrb[0].mxu1 }
 0x1d2   :  { %v421_v49 = vadd.f32 %v420_v48, %v352_v47  ;;  %v540_v50 = vpop.f32.mrb[1].mxu1 }
 0x1d4   :  { %424 = vst [vmem:[%s742_s5] sm:$0xff] %v421_v49 }

</bundles_post_ra>
